<compile_context>
chip_gen: v7x
topology: tpu7x:2x2x1
jax: 0.10.0
libtpu: 0.0.40
codegen_flags: <defaults>
</compile_context>

<pallas_src>
import functools

import jax
import jax.numpy as jnp
from jax.experimental import pallas as pl
from jax.experimental.pallas import tpu as pltpu


def mlp_kernel(x_ref, w1_ref, b1_ref, w2_ref, b2_ref, w3_ref, b3_ref, o_ref):
    # x_ref: (TM, IN_P) bf16; weights bf16; biases f32; output f32.
    x = x_ref[...]
    h1 = jnp.dot(x, w1_ref[...], preferred_element_type=jnp.float32) + b1_ref[...]
    h1 = jnp.maximum(h1, 0.0)
    h2 = jnp.dot(h1.astype(jnp.bfloat16), w2_ref[...],
                 preferred_element_type=jnp.float32) + b2_ref[...]
    h2 = jnp.maximum(h2, 0.0)
    z = jnp.dot(h2.astype(jnp.bfloat16), w3_ref[...],
                preferred_element_type=jnp.float32) + b3_ref[...]
    # Sigmoid: exp on EUP, approx reciprocal also on EUP (otherwise-idle slot).
    o_ref[...] = pl.reciprocal(1.0 + jnp.exp(-z), approx=True)


def _round_up(x, m):
    return (x + m - 1) // m * m


@functools.partial(jax.jit, static_argnames=("max_tile_rows",))
def neural_net_forward(x, params, *, max_tile_rows=512):
    """x: (B, input_size) float32. params: dict of w1,b1,w2,b2,w3,b3 (f32)."""
    B, in_dim = x.shape
    hid = params["w1"].shape[1]
    out_dim = params["w3"].shape[1]

    # Lane-dense padded sizes.
    IN_P = _round_up(in_dim, 128)
    HID_P = _round_up(hid, 128)
    OUT_P = _round_up(out_dim, 128)
    TM = min(max_tile_rows, _round_up(B, 8))   # batch tile, multiple of 8 sublanes
    B_P = _round_up(B, TM)

    # Pad + cast matmul operands to bf16 (f32 accumulation inside the kernel).
    xp = jnp.zeros((B_P, IN_P), jnp.bfloat16).at[:B, :in_dim].set(
        x.astype(jnp.bfloat16))

    def pad_w(w, r, c):
        return jnp.zeros((r, c), jnp.bfloat16).at[:w.shape[0], :w.shape[1]].set(
            w.astype(jnp.bfloat16))

    def pad_b(b, c):
        return jnp.zeros((1, c), jnp.float32).at[:, :b.shape[1]].set(
            b.astype(jnp.float32))

    w1 = pad_w(params["w1"], IN_P, HID_P)
    b1 = pad_b(params["b1"], HID_P)
    w2 = pad_w(params["w2"], HID_P, HID_P)
    b2 = pad_b(params["b2"], HID_P)
    w3 = pad_w(params["w3"], HID_P, OUT_P)
    b3 = pad_b(params["b3"], OUT_P)

    # Weights/biases: constant index_map -> resident in VMEM across grid steps.
    const2d = lambda shape: pl.BlockSpec(shape, lambda i: (0, 0))

    out = pl.pallas_call(
        mlp_kernel,
        out_shape=jax.ShapeDtypeStruct((B_P, OUT_P), jnp.float32),
        grid=(B_P // TM,),
        in_specs=[
            pl.BlockSpec((TM, IN_P), lambda i: (i, 0)),   # x: tiled over batch
            const2d((IN_P, HID_P)),  const2d((1, HID_P)),  # w1, b1
            const2d((HID_P, HID_P)), const2d((1, HID_P)),  # w2, b2
            const2d((HID_P, OUT_P)), const2d((1, OUT_P)),  # w3, b3
        ],
        out_specs=pl.BlockSpec((TM, OUT_P), lambda i: (i, 0)),
        compiler_params=pltpu.CompilerParams(
            dimension_semantics=("parallel",)),  # shards batch tiles across TCs on v7x
    )(xp, w1, b1, w2, b2, w3, b3)

    return out[:B, :out_dim]


def init_params(key, input_size, hidden_size, output):
    """Deterministic init mimicking PyTorch nn.Linear default (uniform +-1/sqrt(fan_in)).

    Weights stored as (in_features, out_features): y = x @ W + b == x @ W_torch.T + b.
    """
    ks = jax.random.split(key, 6)

    def lin(kw, kb, fan_in, fan_out):
        bound = 1.0 / jnp.sqrt(fan_in)
        w = jax.random.uniform(kw, (fan_in, fan_out), jnp.float32, -bound, bound)
        b = jax.random.uniform(kb, (1, fan_out), jnp.float32, -bound, bound)
        return w, b

    w1, b1 = lin(ks[0], ks[1], input_size, hidden_size)
    w2, b2 = lin(ks[2], ks[3], hidden_size, hidden_size)
    w3, b3 = lin(ks[4], ks[5], hidden_size, output)
    return {"w1": w1, "b1": b1, "w2": w2, "b2": b2, "w3": w3, "b3": b3}


if __name__ == "__main__":
    key = jax.random.PRNGKey(0)
    k_x, k_p = jax.random.split(key)

    batch = 8
    input_size = 32
    hidden_size = 32
    output = 16

    x = jax.random.normal(k_x, (batch, input_size), jnp.float32)
    params = init_params(k_p, input_size, hidden_size, output)

    out = neural_net_forward(x, params)
    out = jax.block_until_ready(out)
    assert out.shape == (batch, output)

    # Pure-JAX f32 reference (module semantics). Kernel uses bf16 matmul operands
    # with f32 accumulation, so compare with a bf16-appropriate tolerance.
    h1 = jnp.maximum(x @ params["w1"] + params["b1"], 0.0)
    h2 = jnp.maximum(h1 @ params["w2"] + params["b2"], 0.0)
    ref = jax.nn.sigmoid(h2 @ params["w3"] + params["b3"])
    assert jnp.allclose(out, ref, atol=2e-2, rtol=2e-2), (
        f"mismatch vs reference: max abs err {jnp.max(jnp.abs(out - ref))}")

    print("KERNEL_OK")
</pallas_src>

<mosaic_0001>
module attributes {stable_mosaic.version = 11 : i64} {
  func.func @mlp_kernel(%arg0: i32, %arg1: memref<8x128xbf16, #tpu.memory_space<vmem>>, %arg2: memref<128x128xbf16, #tpu.memory_space<vmem>>, %arg3: memref<1x128xf32, #tpu.memory_space<vmem>>, %arg4: memref<128x128xbf16, #tpu.memory_space<vmem>>, %arg5: memref<1x128xf32, #tpu.memory_space<vmem>>, %arg6: memref<128x128xbf16, #tpu.memory_space<vmem>>, %arg7: memref<1x128xf32, #tpu.memory_space<vmem>>, %arg8: memref<8x128xf32, #tpu.memory_space<vmem>>) attributes {dimension_semantics = [#tpu.dimension_semantics<parallel>], iteration_bounds = array<i64: 1>, scalar_prefetch = 0 : i64, scratch_operands = 0 : i64, tpu.core_type = #tpu.core_type<tc>, window_params = [{transform_indices = @transform_0, window_bounds = array<i64: 8, 128>}, {pipeline_mode = #tpu.pipeline_mode<synchronous>, transform_indices = @transform_1, window_bounds = array<i64: 128, 128>}, {pipeline_mode = #tpu.pipeline_mode<synchronous>, transform_indices = @transform_2, window_bounds = array<i64: 1, 128>}, {pipeline_mode = #tpu.pipeline_mode<synchronous>, transform_indices = @transform_3, window_bounds = array<i64: 128, 128>}, {pipeline_mode = #tpu.pipeline_mode<synchronous>, transform_indices = @transform_4, window_bounds = array<i64: 1, 128>}, {pipeline_mode = #tpu.pipeline_mode<synchronous>, transform_indices = @transform_5, window_bounds = array<i64: 128, 128>}, {pipeline_mode = #tpu.pipeline_mode<synchronous>, transform_indices = @transform_6, window_bounds = array<i64: 1, 128>}, {transform_indices = @transform_7, window_bounds = array<i64: 8, 128>}]} {
    %c0 = arith.constant 0 : index
    %c0_0 = arith.constant 0 : index
    %0 = vector.load %arg1[%c0, %c0_0] : memref<8x128xbf16, #tpu.memory_space<vmem>>, vector<8x128xbf16>
    %c0_1 = arith.constant 0 : index
    %c0_2 = arith.constant 0 : index
    %1 = vector.load %arg2[%c0_1, %c0_2] : memref<128x128xbf16, #tpu.memory_space<vmem>>, vector<128x128xbf16>
    %cst = arith.constant dense<0.000000e+00> : vector<8x128xf32>
    %2 = tpu.matmul %0, %1, %cst {dimension_numbers = #tpu.dot_dimension_numbers<[1], [0], [0], [1], [0, 0, 1, 1], [], []>} : vector<8x128xbf16>, vector<128x128xbf16>, vector<8x128xf32> -> vector<8x128xf32>
    %c0_3 = arith.constant 0 : index
    %c0_4 = arith.constant 0 : index
    %3 = vector.load %arg3[%c0_3, %c0_4] : memref<1x128xf32, #tpu.memory_space<vmem>>, vector<1x128xf32>
    %4 = vector.broadcast %3 : vector<1x128xf32> to vector<8x128xf32>
    %5 = arith.addf %2, %4 : vector<8x128xf32>
    %cst_5 = arith.constant 0.000000e+00 : f32
    %6 = vector.broadcast %cst_5 : f32 to vector<8x128xf32>
    %7 = arith.maximumf %5, %6 : vector<8x128xf32>
    %8 = arith.truncf %7 : vector<8x128xf32> to vector<8x128xbf16>
    %c0_6 = arith.constant 0 : index
    %c0_7 = arith.constant 0 : index
    %9 = vector.load %arg4[%c0_6, %c0_7] : memref<128x128xbf16, #tpu.memory_space<vmem>>, vector<128x128xbf16>
    %cst_8 = arith.constant dense<0.000000e+00> : vector<8x128xf32>
    %10 = tpu.matmul %8, %9, %cst_8 {dimension_numbers = #tpu.dot_dimension_numbers<[1], [0], [0], [1], [0, 0, 1, 1], [], []>} : vector<8x128xbf16>, vector<128x128xbf16>, vector<8x128xf32> -> vector<8x128xf32>
    %c0_9 = arith.constant 0 : index
    %c0_10 = arith.constant 0 : index
    %11 = vector.load %arg5[%c0_9, %c0_10] : memref<1x128xf32, #tpu.memory_space<vmem>>, vector<1x128xf32>
    %12 = vector.broadcast %11 : vector<1x128xf32> to vector<8x128xf32>
    %13 = arith.addf %10, %12 : vector<8x128xf32>
    %cst_11 = arith.constant 0.000000e+00 : f32
    %14 = vector.broadcast %cst_11 : f32 to vector<8x128xf32>
    %15 = arith.maximumf %13, %14 : vector<8x128xf32>
    %16 = arith.truncf %15 : vector<8x128xf32> to vector<8x128xbf16>
    %c0_12 = arith.constant 0 : index
    %c0_13 = arith.constant 0 : index
    %17 = vector.load %arg6[%c0_12, %c0_13] : memref<128x128xbf16, #tpu.memory_space<vmem>>, vector<128x128xbf16>
    %cst_14 = arith.constant dense<0.000000e+00> : vector<8x128xf32>
    %18 = tpu.matmul %16, %17, %cst_14 {dimension_numbers = #tpu.dot_dimension_numbers<[1], [0], [0], [1], [0, 0, 1, 1], [], []>} : vector<8x128xbf16>, vector<128x128xbf16>, vector<8x128xf32> -> vector<8x128xf32>
    %c0_15 = arith.constant 0 : index
    %c0_16 = arith.constant 0 : index
    %19 = vector.load %arg7[%c0_15, %c0_16] : memref<1x128xf32, #tpu.memory_space<vmem>>, vector<1x128xf32>
    %20 = vector.broadcast %19 : vector<1x128xf32> to vector<8x128xf32>
    %21 = arith.addf %18, %20 : vector<8x128xf32>
    %cst_17 = arith.constant 0.000000e+00 : f32
    %22 = vector.broadcast %cst_17 : f32 to vector<8x128xf32>
    %23 = arith.subf %22, %21 : vector<8x128xf32>
    %24 = math.exp %23 : vector<8x128xf32>
    %cst_18 = arith.constant 1.000000e+00 : f32
    %25 = vector.broadcast %cst_18 : f32 to vector<8x128xf32>
    %26 = arith.addf %25, %24 : vector<8x128xf32>
    %27 = tpu.reciprocal %26 {approx = true} : vector<8x128xf32> -> vector<8x128xf32>
    %c0_19 = arith.constant 0 : index
    %c0_20 = arith.constant 0 : index
    %28 = vector.load %arg8[%c0_19, %c0_20] : memref<8x128xf32, #tpu.memory_space<vmem>>, vector<8x128xf32>
    tpu.vector_store %arg8[%c0_19, %c0_20], %27 {strides = array<i32>} : memref<8x128xf32, #tpu.memory_space<vmem>>, vector<8x128xf32>,
    return
  }
  func.func @transform_0(%arg0: i32) -> (i32, i32) {
    %c0_i32 = arith.constant 0 : i32
    %c0_i32_0 = arith.constant 0 : i32
    return %arg0, %c0_i32 : i32, i32
  }
  func.func @transform_1(%arg0: i32) -> (i32, i32) {
    %c0_i32 = arith.constant 0 : i32
    %c0_i32_0 = arith.constant 0 : i32
    %c0_i32_1 = arith.constant 0 : i32
    return %c0_i32, %c0_i32_0 : i32, i32
  }
  func.func @transform_2(%arg0: i32) -> (i32, i32) {
    %c0_i32 = arith.constant 0 : i32
    %c0_i32_0 = arith.constant 0 : i32
    %c0_i32_1 = arith.constant 0 : i32
    return %c0_i32, %c0_i32_0 : i32, i32
  }
  func.func @transform_3(%arg0: i32) -> (i32, i32) {
    %c0_i32 = arith.constant 0 : i32
    %c0_i32_0 = arith.constant 0 : i32
    %c0_i32_1 = arith.constant 0 : i32
    return %c0_i32, %c0_i32_0 : i32, i32
  }
  func.func @transform_4(%arg0: i32) -> (i32, i32) {
    %c0_i32 = arith.constant 0 : i32
    %c0_i32_0 = arith.constant 0 : i32
    %c0_i32_1 = arith.constant 0 : i32
    return %c0_i32, %c0_i32_0 : i32, i32
  }
  func.func @transform_5(%arg0: i32) -> (i32, i32) {
    %c0_i32 = arith.constant 0 : i32
    %c0_i32_0 = arith.constant 0 : i32
    %c0_i32_1 = arith.constant 0 : i32
    return %c0_i32, %c0_i32_0 : i32, i32
  }
  func.func @transform_6(%arg0: i32) -> (i32, i32) {
    %c0_i32 = arith.constant 0 : i32
    %c0_i32_0 = arith.constant 0 : i32
    %c0_i32_1 = arith.constant 0 : i32
    return %c0_i32, %c0_i32_0 : i32, i32
  }
  func.func @transform_7(%arg0: i32) -> (i32, i32) {
    %c0_i32 = arith.constant 0 : i32
    %c0_i32_0 = arith.constant 0 : i32
    return %arg0, %c0_i32 : i32, i32
  }
}

</mosaic_0001>

<bundles_post_ra>
// kernel: neural_net_forward.1
= control target key start
LH: loop header
LB: loop body
LE: loop exit
PB: predicated region body
PF: predicated region fallthrough
CT: control target
= control target key end

     0   :  { %v555_v1 = vmov 0.0   ;;  %vm556_vm0 = vmmov 0   ;;  %s724_s0 = inlined_call_operand.vmem [shape: bf16[8,128], index: 0, kind: input, shape index: {}]   ;;  %s725_s1 = inlined_call_operand.vmem [shape: bf16[128,128], index: 1, kind: input, shape index: {}]   ;;  %s726_s2 = inlined_call_operand.vmem [shape: f32[1,128], index: 2, kind: input, shape index: {}]   ;;  %s727_s3 = inlined_call_operand.vmem [shape: bf16[128,128], index: 3, kind: input, shape index: {}]   ;;  %s728_s4 = inlined_call_operand.vmem [shape: f32[1,128], index: 4, kind: input, shape index: {}]   ;;  %s729_s5 = inlined_call_operand.vmem [shape: bf16[128,128], index: 5, kind: input, shape index: {}]   ;;  %s730_s6 = inlined_call_operand.vmem [shape: f32[1,128], index: 6, kind: input, shape index: {}]   ;;  %s731_s7 = inlined_call_operand.hbm [shape: f32[8,128], index: 7, kind: output, shape index: {}]  }
   0x1   :  { %v503_v0 = vld [vmem:[%s725_s1] sm:$0xff]   ;;  %440 = vmatprep.subr.bf16.mxu0 %v555_v1  ;;  %460 = vmatprep.subr.bf16.mxu1 %v555_v1  ;;  %v504_v2 = vld [vmem:[%s725_s1 + $0x8] sm:$0xff]   ;;  %v505_v3 = vld [vmem:[%s725_s1 + $0x10] sm:$0xff]  }
   0x2   :  { %441 = vmatpush3.bf16.msra.mxu0 %v503_v0  ;;  %456 = vmatprep.mubr.msk.bf16.mxu0 %vm556_vm0, %v555_v1  ;;  %v511_v4 = vld [vmem:[%s727_s3] sm:$0xff]   ;;  %v506_v5 = vld [vmem:[%s725_s1 + $0x18] sm:$0xff]   ;;  %v512_v6 = vld [vmem:[%s727_s3 + $0x8] sm:$0xff]  }
   0x3   :  { %442 = vmatprep.subr.bf16.mxu0 %v555_v1  ;;  %476 = vmatprep.mubr.msk.bf16.mxu1 %vm556_vm0, %v555_v1  ;;  %v507_v7 = vld [vmem:[%s725_s1 + $0x20] sm:$0xff]   ;;  %v513_v8 = vld [vmem:[%s727_s3 + $0x10] sm:$0xff]   ;;  %v508_v9 = vld [vmem:[%s725_s1 + $0x28] sm:$0xff]  }
   0x4   :  { %461 = vmatpush3.bf16.msra.mxu1 %v511_v4  ;;  %v514_v10 = vld [vmem:[%s727_s3 + $0x18] sm:$0xff]  }
   0x5   :  { %462 = vmatprep.subr.bf16.mxu1 %v555_v1 }
   0x6   :  { %443 = vmatpush3.bf16.msra.mxu0 %v504_v2 }
   0x7   :  { %444 = vmatprep.subr.bf16.mxu0 %v555_v1 }
   0x8   :  { %463 = vmatpush3.bf16.msra.mxu1 %v512_v6 }
   0x9   :  { %464 = vmatprep.subr.bf16.mxu1 %v555_v1 }
   0xa   :  { %445 = vmatpush3.bf16.msra.mxu0 %v505_v3 }
   0xb   :  { %446 = vmatprep.subr.bf16.mxu0 %v555_v1 }
   0xc   :  { %465 = vmatpush3.bf16.msra.mxu1 %v513_v8 }
   0xd   :  { %466 = vmatprep.subr.bf16.mxu1 %v555_v1 }
   0xe   :  { %447 = vmatpush3.bf16.msra.mxu0 %v506_v5 }
   0xf   :  { %448 = vmatprep.subr.bf16.mxu0 %v555_v1 }
  0x12   :  { %449 = vmatpush3.bf16.msra.mxu0 %v507_v7 }
  0x13   :  { %450 = vmatprep.subr.bf16.mxu0 %v555_v1 }
  0x14   :  { %12 = vsyncpa [#allocation3], 0  ;;  %v509_v11 = vld [vmem:[%s725_s1 + $0x30] sm:$0xff]   ;;  %467 = vmatpush3.bf16.msra.mxu1 %v514_v10  ;;  %v515_v12 = vld [vmem:[%s727_s3 + $0x20] sm:$0xff]  }
  0x15   :  { %468 = vmatprep.subr.bf16.mxu1 %v555_v1  ;;  %v510_v13 = vld [vmem:[%s725_s1 + $0x38] sm:$0xff]   ;;  %v516_v14 = vld [vmem:[%s727_s3 + $0x28] sm:$0xff]   ;;  %v28_v15 = vld [vmem:[%s724_s0] sm:$0xf] }
  0x16   :  { %451 = vmatpush3.bf16.msra.mxu0 %v508_v9  ;;  %v517_v16 = vld [vmem:[%s727_s3 + $0x30] sm:$0xff]   ;;  %v518_v17 = vld [vmem:[%s727_s3 + $0x38] sm:$0xff]   ;;  %v519_v18 = vld [vmem:[%s729_s5] sm:$0xff]  }
  0x17   :  { %452 = vmatprep.subr.bf16.mxu0 %v555_v1  ;;  %v520_v19 = vld [vmem:[%s729_s5 + $0x8] sm:$0xff]   ;;  %v521_v20 = vld [vmem:[%s729_s5 + $0x10] sm:$0xff]   ;;  %v522_v21 = vld [vmem:[%s729_s5 + $0x18] sm:$0xff]  }
  0x18   :  { %469 = vmatpush3.bf16.msra.mxu1 %v515_v12  ;;  %v523_v22 = vld [vmem:[%s729_s5 + $0x20] sm:$0xff]   ;;  %v524_v23 = vld [vmem:[%s729_s5 + $0x28] sm:$0xff]   ;;  %v525_v32 = vld [vmem:[%s729_s5 + $0x30] sm:$0xff]  }
  0x19   :  { %470 = vmatprep.subr.bf16.mxu1 %v555_v1  ;;  %v386_v24 = vld [vmem:[%s726_s2] ss:$0 sm:$0xff]  ;;  %v526_v33 = vld [vmem:[%s729_s5 + $0x38] sm:$0xff]  }
  0x1a   :  { %453 = vmatpush3.bf16.msra.mxu0 %v509_v11  ;;  %v395_v34 = vld [vmem:[%s728_s4] ss:$0 sm:$0xff]  ;;  %s557_s4 = smov [#allocation2]  }
  0x1b   :  { %454 = vmatprep.subr.bf16.mxu0 %v555_v1  ;;  %v404_v42 = vld [vmem:[%s730_s6] ss:$0 sm:$0xff]  ;;  %s378_s5 = sshll.u32 %s557_s4, 4  ;;  %s379_s5 = int_to_ptr.vmem [resolvable:$true] %s378_s5 }
  0x1c   :  { %471 = vmatpush3.bf16.msra.mxu1 %v516_v14  ;;  %s531_s30 = scalar_lea.vmem %s379_s5, 128  ;;  %p536_p1 = scmp.lt.s32.totalorder %s379_s5, %s379_s5 }
  0x1d   :  { %472 = vmatprep.subr.bf16.mxu1 %v555_v1  ;;  %p532_p0 = scmp.ne.s32.totalorder %s379_s5, %s531_s30  ;;  %p537_p2 = scmp.lt.s32.totalorder %s531_s30, %s531_s30 }
  0x1e   :  { %455 = vmatpush3.bf16.msra.mxu0 %v510_v13 }
  0x1f   :  { %480 = vmatprep.subr.bf16.mxu0 %v555_v1  ;;  %p538_p3 = por %p537_p2, %p536_p1 }
  0x20   :  { %473 = vmatpush3.bf16.msra.mxu1 %v517_v16 }
  0x21   :  { %457 = vmatmul.mubr.bf16.vlgmr.msra.gmra.mrb[0].mxu0 %v28_v15  ;;  %474 = vmatprep.subr.bf16.mxu1 %v555_v1  ;;  %p539_p4 = pnand %p538_p3, %p532_p0 }
  0x22   :  { %496 = vmatprep.mubr.msk.bf16.mxu0 %vm556_vm0, %v555_v1  ;;  %481 = vmatpush3.bf16.msra.mxu0 %v519_v18 }
  0x23   :  { %482 = vmatprep.subr.bf16.mxu0 %v555_v1 }
  0x24   :  { %475 = vmatpush3.bf16.msra.mxu1 %v518_v17 }
  0x26   :  { %483 = vmatpush3.bf16.msra.mxu0 %v520_v19 }
  0x27   :  { %484 = vmatprep.subr.bf16.mxu0 %v555_v1 }
  0x2a   :  { %485 = vmatpush3.bf16.msra.mxu0 %v521_v20 }
  0x2b   :  { %486 = vmatprep.subr.bf16.mxu0 %v555_v1 }
  0x2e   :  { %487 = vmatpush3.bf16.msra.mxu0 %v522_v21 }
  0x2f   :  { %488 = vmatprep.subr.bf16.mxu0 %v555_v1 }
  0x32   :  { %489 = vmatpush3.bf16.msra.mxu0 %v523_v22 }
  0x33   :  { %490 = vmatprep.subr.bf16.mxu0 %v555_v1 }
  0x36   :  { %491 = vmatpush3.bf16.msra.mxu0 %v524_v23 }
  0x37   :  { %492 = vmatprep.subr.bf16.mxu0 %v555_v1 }
  0x3a   :  { %493 = vmatpush3.bf16.msra.mxu0 %v525_v32 }
  0x3b   :  { %494 = vmatprep.subr.bf16.mxu0 %v555_v1 }
  0x3e   :  { %495 = vmatpush3.bf16.msra.mxu0 %v526_v33 }
  0xf4   :  { %v134_v25 = vpop.f32.mrb[0].mxu0 }
  0xf5   :  { %v135_v26 = vadd.f32 %v386_v24, %v134_v25  ;;  %v458_v27 = vpop.f32.mrb[1].mxu0 }
  0xf6   :  { %v137_v28 = vpop.f32.mrb[2].mxu0 }
  0xf7   :  { %v140_v29 = vmax.f32 %v135_v26, 0.0  ;;  %v459_v30 = vpop.f32.mrb[3].mxu0 }
  0xf9   :  { %v141_v31 = vpack.c.bf16 %v140_v29, %v140_v29 }
  0xfb   :  { %477 = vmatmul.mubr.bf16.vlgmr.msra.gmra.mrb[0].mxu1 %v141_v31 }
 0x1ce   :  { %v247_v35 = vpop.f32.mrb[0].mxu1 }
 0x1cf   :  { %v248_v36 = vadd.f32 %v395_v34, %v247_v35  ;;  %v478_v37 = vpop.f32.mrb[1].mxu1 }
 0x1d0   :  { %v250_v38 = vpop.f32.mrb[2].mxu1 }
 0x1d1   :  { %v253_v39 = vmax.f32 %v248_v36, 0.0  ;;  %v479_v40 = vpop.f32.mrb[3].mxu1 }
 0x1d3   :  { %v254_v41 = vpack.c.bf16 %v253_v39, %v253_v39 }
 0x1d5   :  { %497 = vmatmul.mubr.bf16.vlgmr.msra.gmra.mrb[4].mxu0 %v254_v41 }
 0x2a8   :  { %v360_v43 = vpop.f32.mrb[4].mxu0 }
 0x2a9   :  { %v361_v44 = vadd.f32 %v404_v42, %v360_v43  ;;  %v498_v45 = vpop.f32.mrb[5].mxu0 }
 0x2aa   :  { %v363_v46 = vpop.f32.mrb[6].mxu0 }
 0x2ab   :  { %v366_v47 = vsub.f32 0.0, %v361_v44  ;;  %v499_v48 = vpop.f32.mrb[7].mxu0 }
 0x2ad   :  { %v367_v49 = vmul.f32 1.442695, %v366_v47 }
 0x2af   :  { %527 = vpow2.f32 %v367_v49 }
 0x2b9   :  { %v528_v50 = vpop.eup %527 }
 0x2ba   :  { %v369_v51 = vadd.f32 1.0, %v528_v50 }
 0x2bc   :  { %529 = vrcp.f32 %v369_v51 }
 0x2c6   :  { %v530_v52 = vpop.eup %529 }
 0x2c7   :  { %371 = vst [vmem:[#allocation2] sm:$0xff] %v530_v52 }
 0x2c8   :  { %542 = shalt.err (!%p539_p4)
}
 0x2c9   :  { %s543_s8 = scalar_lea.hbm %s731_s7, 128 }
 0x2ca   :  { %p544_p5 = scmp.ne.s32.totalorder %s731_s7, %s543_s8  ;;  %p547_p6 = scmp.lt.u32.totalorder %s543_s8, %s731_s7 }
 0x2cc   :  { %p549_p7 = pnand %p547_p6, %p544_p5 }
 0x2ce   :  { %552 = shalt.err (!%p549_p7)
}
 0x2cf   :  { %381 = dma.vmem_to_hbm [thread:$0]  %s379_s5, 128, %s731_s7, [#allocation3]  }
 0x2d0   :  { %553 = dma.done.wait [#allocation3], 128  }
 0x2d1   :  { %554 = vsyncadd [#allocation3], 4294967168 }
 0x2d2   :  { %385 = vsyncpa [#allocation3], 1 }

</bundles_post_ra>
